<compile_context>
chip_gen: v7x
topology: tpu7x:2x2x1
jax: 0.10.0
libtpu: 0.0.40
codegen_flags: <defaults>
</compile_context>

<pallas_src>
import functools

import numpy as np
import jax
import jax.numpy as jnp
from jax.experimental import pallas as pl
from jax.experimental.pallas import tpu as pltpu

_EPS = 1e-12
_MMCE_COEFF = 2.0  # stands in for loss_conf['mmce_coeff']


# --------------------------------------------------------------------------
# Stage 1: per-sample statistics, lane-dense layout (samples on lanes).
# Input : logits (C, T) tile, target (1, T) tile.
# Output: stats (8, T) tile, rows = [p, wf, wc, matched, ce, u, v, 0] with
#         u = exp(-2.5 p), v = exp(+2.5 p)  (so stage 2 needs no exp at all).
# --------------------------------------------------------------------------
def _stats_kernel(logits_ref, tgt_ref, stats_ref, *, n_valid):
    i = pl.program_id(0)
    logits = logits_ref[...]                       # (C, T) f32, classes on sublanes
    tgt = tgt_ref[...]                             # (1, T) i32
    C, T = logits.shape

    col_max = jnp.max(logits, axis=0, keepdims=True)          # (1, T)
    e = jnp.exp(logits - col_max)                              # (C, T)
    denom = jnp.sum(e, axis=0, keepdims=True)                  # (1, T)
    # max softmax prob == exp(0) / denom == 1 / denom  (no full softmax needed)
    p = jnp.clip(1.0 / denom, _EPS, 1.0 - _EPS)                # (1, T)

    iota_c = jax.lax.broadcasted_iota(jnp.int32, (C, T), 0)
    is_max = logits == col_max
    # first index achieving the max (argmax of softmax == argmax of logits)
    labels = jnp.min(jnp.where(is_max, iota_c.astype(jnp.float32), float(C)),
                     axis=0, keepdims=True)                    # (1, T)
    matched = (labels == tgt.astype(jnp.float32)).astype(jnp.float32)

    # per-sample cross entropy: logsumexp(logits) - logit_at_target
    logit_t = jnp.sum(jnp.where(iota_c == tgt, logits, 0.0),
                      axis=0, keepdims=True)                   # (1, T)
    ce = jnp.log(denom) + col_max - logit_t                    # (1, T)

    # mask padded samples (N need not be a multiple of the tile size)
    col = i * T + jax.lax.broadcasted_iota(jnp.int32, (1, T), 1)
    validf = (col < n_valid).astype(jnp.float32)

    matched = matched * validf
    wf = (1.0 - matched) * p * validf      # wrong   samples, weight     p_i
    wc = matched * (1.0 - p)               # correct samples, weight 1 - p_i
    ce = ce * validf

    # O(N) exp here replaces the O(N^2) exp in the pairwise phase:
    #   exp(-2.5*|pi-pj|) == min(u_i*v_j, v_i*u_j),  u,v in [~0.082, ~12.2].
    u = jnp.exp(-2.5 * p)                                      # (1, T)
    v = jnp.exp(2.5 * p)                                       # (1, T)

    # direct sublane stores (padded lanes keep wf = wc = ce = matched = 0)
    stats_ref[0:1, :] = p
    stats_ref[1:2, :] = wf
    stats_ref[2:3, :] = wc
    stats_ref[3:4, :] = matched
    stats_ref[4:5, :] = ce
    stats_ref[5:6, :] = u
    stats_ref[6:7, :] = v
    stats_ref[7:8, :] = jnp.zeros_like(p)


# --------------------------------------------------------------------------
# Stage 2: upper-triangular tiled pairwise phase.  grid = (n_pairs,), where
# pair p covers row tile i = i_idx[p], col tile j = j_idx[p], j >= i.
#   coli_ref : (T, 8) stats for row tile i (column form) -> u_i, v_i columns
#   rowi_ref : (8, T) stats for row tile i (row form)    -> left weights (MXU LHS)
#   rowj_ref : (8, T) stats for col tile j (row form)    -> u_j, v_j rows
#   colj_ref : (T, 8) stats for col tile j (column form) -> MXU RHS weights
#   out_ref  : (1, 8, 8) bilinear block S[r,c] = sum_ab rowi[r,a] K[a,b] colj[b,c]
#              (S[1,1]=ff, S[2,2]=cc, S[2,1]=cf, S[1,2]=fc; combined in wrapper)
# --------------------------------------------------------------------------
def _pair_kernel(i_idx_ref, j_idx_ref, coli_ref, rowi_ref, rowj_ref, colj_ref,
                 out_ref, *, compute_dtype):
    del i_idx_ref, j_idx_ref  # only used by the index_maps

    coli = coli_ref[...]                                   # (T, 8) f32
    u_i = coli[:, 5:6].astype(compute_dtype)               # (T, 1)
    v_i = coli[:, 6:7].astype(compute_dtype)               # (T, 1)
    u_j = rowj_ref[5:6, :].astype(compute_dtype)           # (1, T)
    v_j = rowj_ref[6:7, :].astype(compute_dtype)           # (1, T)

    # exact Laplacian kernel without any exp: VPU-only (2 mul + 1 min)
    K = jnp.minimum(u_i * v_j, v_i * u_j)                  # (T, T)

    # MXU, kept in the K(T,T) @ RHS(T,8) orientation
    kw = jnp.dot(K, colj_ref[...].astype(compute_dtype),
                 preferred_element_type=jnp.float32)       # (T, 8)

    # left contraction as one tiny MXU matmul (no per-step XLU reductions)
    S = jnp.dot(rowi_ref[...], kw,
                preferred_element_type=jnp.float32)        # (8, 8)
    out_ref[...] = S.reshape(1, 8, 8)


def mmce_loss(logits, target, mmce_coeff=_MMCE_COEFF, bf16_pairwise=False):
    """MMCE_m + mean cross-entropy; logits (N, C) float, target (N,) int.

    bf16_pairwise: set True on v6e/v7x to run the (T,T) elementwise + MXU work
    in bf16 (~2x VPU throughput, half the VMEM); slightly looser numerics.
    Keep False on v5e (no bf16 VPU).
    """
    N, C = logits.shape

    # Tile selection: grow toward T=1024 for large N, but keep >=2 row tiles
    # whenever N >= 512 so the v7x megacore 'parallel' axis has work for both
    # TensorCores; T=1024 f32 stays within a 32 MiB VMEM budget (v7x-safe).
    if N >= 2048:
        T = 1024
    elif N >= 1024:
        T = 512
    elif N >= 512:
        T = 256
    else:
        T = 128
    n_tiles = pl.cdiv(N, T)
    Npad = n_tiles * T

    # lane-dense layouts (samples on lanes), padded to a tile multiple
    logits_t = jnp.pad(logits.astype(jnp.float32).T, ((0, 0), (0, Npad - N)))
    tgt_row = jnp.pad(jnp.asarray(target, jnp.int32).reshape(1, N),
                      ((0, 0), (0, Npad - N)), constant_values=-1)

    vmem_params = pltpu.CompilerParams(
        dimension_semantics=("parallel",),
        vmem_limit_bytes=32 * 1024 * 1024)

    # ---- stage 1: per-sample stats, rows = [p, wf, wc, matched, ce, u, v, 0] ----
    stats = pl.pallas_call(
        functools.partial(_stats_kernel, n_valid=N),
        out_shape=jax.ShapeDtypeStruct((8, Npad), jnp.float32),
        grid=(n_tiles,),
        in_specs=[pl.BlockSpec((C, T), lambda i: (0, i)),
                  pl.BlockSpec((1, T), lambda i: (0, i))],
        out_specs=pl.BlockSpec((8, T), lambda i: (0, i)),
        compiler_params=vmem_params,
    )(logits_t, tgt_row)

    # per-sample reductions come straight from stage 1 (not from the pair loop)
    n_correct = jnp.sum(stats[3, :])
    ce_sum = jnp.sum(stats[4, :])

    # single real transpose (tiny 8 x Npad slab, done by XLA) to get the
    # column form needed for the pair-matrix broadcast / MXU RHS
    col_stats = stats.T                                    # (Npad, 8)

    # ---- stage 2: upper-triangular tile pairs (j >= i), ~1.9x less N^2 work ----
    ii, jj = np.triu_indices(n_tiles)                      # i-major ordering
    n_pairs = int(ii.size)
    i_idx = jnp.asarray(ii, dtype=jnp.int32)
    j_idx = jnp.asarray(jj, dtype=jnp.int32)

    compute_dtype = jnp.bfloat16 if bf16_pairwise else jnp.float32

    s_blocks = pl.pallas_call(
        functools.partial(_pair_kernel, compute_dtype=compute_dtype),
        out_shape=jax.ShapeDtypeStruct((n_pairs, 8, 8), jnp.float32),
        grid_spec=pltpu.PrefetchScalarGridSpec(
            num_scalar_prefetch=2,
            grid=(n_pairs,),
            in_specs=[
                pl.BlockSpec((T, 8), lambda p, it, jt: (it[p], 0)),   # coli
                pl.BlockSpec((8, T), lambda p, it, jt: (0, it[p])),   # rowi
                pl.BlockSpec((8, T), lambda p, it, jt: (0, jt[p])),   # rowj
                pl.BlockSpec((T, 8), lambda p, it, jt: (jt[p], 0)),   # colj
            ],
            out_specs=pl.BlockSpec((1, 8, 8), lambda p, it, jt: (p, 0, 0)),
        ),
        compiler_params=vmem_params,
    )(i_idx, j_idx, col_stats, stats, stats, col_stats)

    # combine per-pair bilinear blocks, exploiting K's symmetry:
    #   ff/cc: off-diagonal tiles count twice; mixed: add both cf and fc
    #   contributions off-diagonal (s_cf is NOT symmetric per tile).
    a_ff = s_blocks[:, 1, 1]
    a_cc = s_blocks[:, 2, 2]
    a_cf = s_blocks[:, 2, 1]
    a_fc = s_blocks[:, 1, 2]
    off_diag = jnp.asarray((ii != jj).astype(np.float32))   # 1.0 where i != j
    s_ff = jnp.sum(a_ff * (1.0 + off_diag))
    s_cc = jnp.sum(a_cc * (1.0 + off_diag))
    s_cf = jnp.sum(a_cf + off_diag * a_fc)

    n_samples = jnp.float32(N)
    n_false = n_samples - n_correct

    part_false = jnp.where(
        n_false > 0, s_ff / jnp.maximum(n_false * n_false, 1.0), 0.0)
    part_correct = jnp.where(
        n_correct > 0, s_cc / jnp.maximum(n_correct * n_correct, 1.0), 0.0)
    part_mixed = jnp.where(
        n_false * n_correct > 0,
        2.0 * s_cf / jnp.maximum(n_false * n_correct, 1.0), 0.0)

    # clamp guards against a tiny negative MMD^2 from fp cancellation
    # (PyTorch has no clamp; identical for all non-degenerate inputs)
    mmd2 = jnp.maximum(part_false + part_correct - part_mixed, 0.0)
    mmce = mmce_coeff * jnp.sqrt(mmd2)
    return mmce + ce_sum / n_samples


def _ref_mmce(logits, target, coeff=_MMCE_COEFF):
    """Pure numpy reference mirroring the PyTorch forward exactly."""
    x = np.asarray(logits, dtype=np.float64)
    t = np.asarray(target)
    m = x.max(axis=1, keepdims=True)
    e = np.exp(x - m)
    sm = e / e.sum(axis=1, keepdims=True)
    probs = np.clip(sm.max(axis=1), 1e-12, 1.0 - 1e-12)
    labels = sm.argmax(axis=1)
    matched = (labels == t).astype(np.int64)
    n = len(matched)
    nc = int(matched.sum())
    pf = probs[matched == 0]
    pc = probs[matched == 1]

    def k(c1, c2):
        return np.exp(-2.5 * np.abs(c1[:, None] - c2[None, :]))

    df = pf[:, None] * pf[None, :]
    dc = (1 - pc)[:, None] * (1 - pc)[None, :]
    dm = (1 - pc)[:, None] * pf[None, :]
    part_false = (df * k(pf, pf)).sum() / float((n - nc) ** 2) if n - nc > 0 else 0.0
    part_correct = (dc * k(pc, pc)).sum() / float(nc ** 2) if nc > 0 else 0.0
    part_mixed = (2 * (dm * k(pc, pf)).sum() / float((n - nc) * nc)
                  if (n - nc) * nc > 0 else 0.0)
    mmce = coeff * np.sqrt(max(part_false + part_correct - part_mixed, 0.0))
    lse = np.log(e.sum(axis=1)) + m[:, 0]
    ce = (lse - x[np.arange(n), t]).mean()
    return mmce + ce


if __name__ == "__main__":
    key = jax.random.PRNGKey(0)
    k1, k2 = jax.random.split(key)
    N, C = 32, 8                                   # batch=32, num_classes=8
    logits = jax.random.normal(k1, (N, C), dtype=jnp.float32) * 2.0
    target = jax.random.randint(k2, (N,), 0, C)

    loss = mmce_loss(logits, target)
    loss = jax.block_until_ready(loss)

    ref = _ref_mmce(np.asarray(logits), np.asarray(target))
    assert np.isfinite(float(loss)), "kernel produced non-finite loss"
    assert np.allclose(float(loss), ref, rtol=1e-4, atol=1e-4), (float(loss), ref)
    print("KERNEL_OK")
</pallas_src>

<mosaic_0001>
module attributes {stable_mosaic.version = 11 : i64} {
  func.func @_stats_kernel(%arg0: i32, %arg1: memref<8x128xf32, #tpu.memory_space<vmem>>, %arg2: memref<1x128xi32, #tpu.memory_space<vmem>>, %arg3: memref<8x128xf32, #tpu.memory_space<vmem>>) attributes {dimension_semantics = [#tpu.dimension_semantics<parallel>], iteration_bounds = array<i64: 1>, scalar_prefetch = 0 : i64, scratch_operands = 0 : i64, tpu.core_type = #tpu.core_type<tc>, window_params = [{transform_indices = @transform_0, window_bounds = array<i64: 8, 128>}, {transform_indices = @transform_1, window_bounds = array<i64: 1, 128>}, {transform_indices = @transform_2, window_bounds = array<i64: 8, 128>}]} {
    %c0 = arith.constant 0 : index
    %c0_0 = arith.constant 0 : index
    %0 = vector.load %arg1[%c0, %c0_0] : memref<8x128xf32, #tpu.memory_space<vmem>>, vector<8x128xf32>
    %c0_1 = arith.constant 0 : index
    %c0_2 = arith.constant 0 : index
    %1 = vector.load %arg2[%c0_1, %c0_2] : memref<1x128xi32, #tpu.memory_space<vmem>>, vector<1x128xi32>
    %cst = arith.constant dense<0xFF800000> : vector<128xf32>
    %2 = vector.multi_reduction <maximumf>, %0, %cst [0] : vector<8x128xf32> to vector<128xf32>
    %3 = vector.shape_cast %2 : vector<128xf32> to vector<1x128xf32>
    %4 = vector.broadcast %3 : vector<1x128xf32> to vector<8x128xf32>
    %5 = arith.subf %0, %4 : vector<8x128xf32>
    %6 = math.exp %5 : vector<8x128xf32>
    %cst_3 = arith.constant dense<0.000000e+00> : vector<128xf32>
    %7 = vector.multi_reduction <add>, %6, %cst_3 [0] : vector<8x128xf32> to vector<128xf32>
    %8 = vector.shape_cast %7 : vector<128xf32> to vector<1x128xf32>
    %cst_4 = arith.constant 1.000000e+00 : f32
    %9 = vector.broadcast %cst_4 : f32 to vector<1x128xf32>
    %10 = arith.divf %9, %8 : vector<1x128xf32>
    %cst_5 = arith.constant 9.99999996E-13 : f32
    %cst_6 = arith.constant 1.000000e+00 : f32
    %11 = vector.broadcast %cst_5 : f32 to vector<1x128xf32>
    %12 = arith.maximumf %11, %10 : vector<1x128xf32>
    %13 = vector.broadcast %cst_6 : f32 to vector<1x128xf32>
    %14 = arith.minimumf %13, %12 : vector<1x128xf32>
    %15 = tpu.iota {dimensions = array<i32: 0>} : vector<8x128xi32>
    %16 = vector.broadcast %3 : vector<1x128xf32> to vector<8x128xf32>
    %17 = arith.cmpf oeq, %0, %16 : vector<8x128xf32>
    %18 = arith.sitofp %15 : vector<8x128xi32> to vector<8x128xf32>
    %cst_7 = arith.constant 8.000000e+00 : f32
    %19 = vector.broadcast %cst_7 : f32 to vector<8x128xf32>
    %20 = arith.select %17, %18, %19 : vector<8x128xi1>, vector<8x128xf32>
    %cst_8 = arith.constant dense<0x7F800000> : vector<128xf32>
    %21 = vector.multi_reduction <minimumf>, %20, %cst_8 [0] : vector<8x128xf32> to vector<128xf32>
    %22 = vector.shape_cast %21 : vector<128xf32> to vector<1x128xf32>
    %23 = arith.sitofp %1 : vector<1x128xi32> to vector<1x128xf32>
    %24 = arith.cmpf oeq, %22, %23 : vector<1x128xf32>
    %25 = arith.extui %24 : vector<1x128xi1> to vector<1x128xi32>
    %26 = arith.sitofp %25 : vector<1x128xi32> to vector<1x128xf32>
    %27 = vector.broadcast %1 : vector<1x128xi32> to vector<8x128xi32>
    %28 = arith.cmpi eq, %15, %27 : vector<8x128xi32>
    %cst_9 = arith.constant 0.000000e+00 : f32
    %29 = vector.broadcast %cst_9 : f32 to vector<8x128xf32>
    %30 = arith.select %28, %0, %29 : vector<8x128xi1>, vector<8x128xf32>
    %cst_10 = arith.constant dense<0.000000e+00> : vector<128xf32>
    %31 = vector.multi_reduction <add>, %30, %cst_10 [0] : vector<8x128xf32> to vector<128xf32>
    %32 = vector.shape_cast %31 : vector<128xf32> to vector<1x128xf32>
    %33 = math.log %8 : vector<1x128xf32>
    %34 = arith.addf %33, %3 : vector<1x128xf32>
    %35 = arith.subf %34, %32 : vector<1x128xf32>
    %c128_i32 = arith.constant 128 : i32
    %36 = arith.muli %arg0, %c128_i32 : i32
    %37 = tpu.iota {dimensions = array<i32: 1>} : vector<1x128xi32>
    %38 = vector.broadcast %36 : i32 to vector<1x128xi32>
    %39 = arith.addi %38, %37 : vector<1x128xi32>
    %c32_i32 = arith.constant 32 : i32
    %40 = vector.broadcast %c32_i32 : i32 to vector<1x128xi32>
    %41 = arith.cmpi slt, %39, %40 : vector<1x128xi32>
    %42 = arith.extui %41 : vector<1x128xi1> to vector<1x128xi32>
    %43 = arith.sitofp %42 : vector<1x128xi32> to vector<1x128xf32>
    %44 = arith.mulf %26, %43 : vector<1x128xf32>
    %cst_11 = arith.constant 1.000000e+00 : f32
    %45 = vector.broadcast %cst_11 : f32 to vector<1x128xf32>
    %46 = arith.subf %45, %44 : vector<1x128xf32>
    %47 = arith.mulf %46, %14 : vector<1x128xf32>
    %48 = arith.mulf %47, %43 : vector<1x128xf32>
    %cst_12 = arith.constant 1.000000e+00 : f32
    %49 = vector.broadcast %cst_12 : f32 to vector<1x128xf32>
    %50 = arith.subf %49, %14 : vector<1x128xf32>
    %51 = arith.mulf %44, %50 : vector<1x128xf32>
    %52 = arith.mulf %35, %43 : vector<1x128xf32>
    %cst_13 = arith.constant -2.500000e+00 : f32
    %53 = vector.broadcast %cst_13 : f32 to vector<1x128xf32>
    %54 = arith.mulf %53, %14 : vector<1x128xf32>
    %55 = math.exp %54 : vector<1x128xf32>
    %cst_14 = arith.constant 2.500000e+00 : f32
    %56 = vector.broadcast %cst_14 : f32 to vector<1x128xf32>
    %57 = arith.mulf %56, %14 : vector<1x128xf32>
    %58 = math.exp %57 : vector<1x128xf32>
    %c0_15 = arith.constant 0 : index
    %c0_16 = arith.constant 0 : index
    %59 = vector.load %arg3[%c0_15, %c0_16] : memref<8x128xf32, #tpu.memory_space<vmem>>, vector<1x128xf32>
    tpu.vector_store %arg3[%c0_15, %c0_16], %14 {strides = array<i32>} : memref<8x128xf32, #tpu.memory_space<vmem>>, vector<1x128xf32>,
    %c1 = arith.constant 1 : index
    %c0_17 = arith.constant 0 : index
    %60 = vector.load %arg3[%c1, %c0_17] : memref<8x128xf32, #tpu.memory_space<vmem>>, vector<1x128xf32>
    tpu.vector_store %arg3[%c1, %c0_17], %48 {strides = array<i32>} : memref<8x128xf32, #tpu.memory_space<vmem>>, vector<1x128xf32>,
    %c2 = arith.constant 2 : index
    %c0_18 = arith.constant 0 : index
    %61 = vector.load %arg3[%c2, %c0_18] : memref<8x128xf32, #tpu.memory_space<vmem>>, vector<1x128xf32>
    tpu.vector_store %arg3[%c2, %c0_18], %51 {strides = array<i32>} : memref<8x128xf32, #tpu.memory_space<vmem>>, vector<1x128xf32>,
    %c3 = arith.constant 3 : index
    %c0_19 = arith.constant 0 : index
    %62 = vector.load %arg3[%c3, %c0_19] : memref<8x128xf32, #tpu.memory_space<vmem>>, vector<1x128xf32>
    tpu.vector_store %arg3[%c3, %c0_19], %44 {strides = array<i32>} : memref<8x128xf32, #tpu.memory_space<vmem>>, vector<1x128xf32>,
    %c4 = arith.constant 4 : index
    %c0_20 = arith.constant 0 : index
    %63 = vector.load %arg3[%c4, %c0_20] : memref<8x128xf32, #tpu.memory_space<vmem>>, vector<1x128xf32>
    tpu.vector_store %arg3[%c4, %c0_20], %52 {strides = array<i32>} : memref<8x128xf32, #tpu.memory_space<vmem>>, vector<1x128xf32>,
    %c5 = arith.constant 5 : index
    %c0_21 = arith.constant 0 : index
    %64 = vector.load %arg3[%c5, %c0_21] : memref<8x128xf32, #tpu.memory_space<vmem>>, vector<1x128xf32>
    tpu.vector_store %arg3[%c5, %c0_21], %55 {strides = array<i32>} : memref<8x128xf32, #tpu.memory_space<vmem>>, vector<1x128xf32>,
    %c6 = arith.constant 6 : index
    %c0_22 = arith.constant 0 : index
    %65 = vector.load %arg3[%c6, %c0_22] : memref<8x128xf32, #tpu.memory_space<vmem>>, vector<1x128xf32>
    tpu.vector_store %arg3[%c6, %c0_22], %58 {strides = array<i32>} : memref<8x128xf32, #tpu.memory_space<vmem>>, vector<1x128xf32>,
    %cst_23 = arith.constant 0.000000e+00 : f32
    %66 = vector.broadcast %cst_23 : f32 to vector<1x128xf32>
    %c7 = arith.constant 7 : index
    %c0_24 = arith.constant 0 : index
    %67 = vector.load %arg3[%c7, %c0_24] : memref<8x128xf32, #tpu.memory_space<vmem>>, vector<1x128xf32>
    tpu.vector_store %arg3[%c7, %c0_24], %66 {strides = array<i32>} : memref<8x128xf32, #tpu.memory_space<vmem>>, vector<1x128xf32>,
    return
  }
  func.func @transform_0(%arg0: i32) -> (i32, i32) {
    %c0_i32 = arith.constant 0 : i32
    %c0_i32_0 = arith.constant 0 : i32
    return %c0_i32, %arg0 : i32, i32
  }
  func.func @transform_1(%arg0: i32) -> (i32, i32) {
    %c0_i32 = arith.constant 0 : i32
    %c0_i32_0 = arith.constant 0 : i32
    return %c0_i32, %arg0 : i32, i32
  }
  func.func @transform_2(%arg0: i32) -> (i32, i32) {
    %c0_i32 = arith.constant 0 : i32
    %c0_i32_0 = arith.constant 0 : i32
    return %c0_i32, %arg0 : i32, i32
  }
}

</mosaic_0001>

<bundles_post_ra>
// kernel: tpu_custom_call.1
= control target key start
LH: loop header
LB: loop body
LE: loop exit
PB: predicated region body
PF: predicated region fallthrough
CT: control target
= control target key end

     0   :  { %7 = vsyncpa [#allocation3], 0  ;;  %s228_s0 = inlined_call_operand.hbm [shape: f32[8,128], index: 0, kind: input, shape index: {}]   ;;  %s229_s1 = inlined_call_operand.vmem [shape: s32[1,128], index: 1, kind: input, shape index: {}]   ;;  %s230_s2 = inlined_call_operand.hbm [shape: f32[8,128], index: 2, kind: output, shape index: {}]  }
   0x1   :  { %8 = vsyncpa [#allocation4], 0  ;;  %s183_s9 = smov [#allocation2]   ;;  %s135_s13 = scalar_lea.hbm %s228_s0, 128 }
   0x2   :  { %s15_s10 = sshll.u32 %s183_s9, 4  ;;  %p136_p0 = scmp.ne.s32.totalorder %s228_s0, %s135_s13  ;;  %s16_s10 = int_to_ptr.vmem [resolvable:$true] %s15_s10 }
   0x3   :  { %p139_p1 = scmp.lt.u32.totalorder %s135_s13, %s228_s0 }
   0x5   :  { %p141_p2 = pnand %p139_p1, %p136_p0 }
   0x7   :  { %144 = shalt.err (!%p141_p2)
}
   0x8   :  { %s145_s18 = scalar_lea.vmem %s16_s10, 128  ;;  %p150_p4 = scmp.lt.s32.totalorder %s16_s10, %s16_s10 }
   0x9   :  { %p146_p3 = scmp.ne.s32.totalorder %s16_s10, %s145_s18  ;;  %p151_p5 = scmp.lt.s32.totalorder %s145_s18, %s145_s18 }
   0xb   :  { %p152_p6 = por %p151_p5, %p150_p4 }
   0xd   :  { %p153_p7 = pnand %p152_p6, %p146_p3 }
   0xf   :  { %156 = shalt.err (!%p153_p7)
}
  0x10   :  { %18 = dma.hbm_to_vmem [thread:$0]  %s228_s0, 128, %s16_s10, [#allocation3]  }
  0x11   :  { %179 = dma.done.wait [#allocation3], 128  }
  0x12   :  { %180 = vsyncadd [#allocation3], 4294967168  ;;  %v184_v0 = vmov 0.0   ;;  %v24_v1 = vld [vmem:[#allocation2] sm:$0xff]  ;;  %v45_v3 = vlaneseq }
  0x13   :  { %104 = vst [vmem:[#allocation5 + $0x7] sm:$0x1] %v184_v0  ;;  %v26_v2 = vrot.slane %v24_v1, 4  ;;  %v25_v17 = vld [vmem:[%s229_s1] sm:$0x1]  ;;  %s185_s1 = smov [#allocation5]  }
  0x14   :  { %v46_v6 = vshrl.u32 %v45_v3, 7  ;;  %v78_v19 = vand.u32 127, %v45_v3  ;;  %v56_v23 = vcvt.s32.f32 %v25_v17  ;;  %s111_s22 = sshll.u32 %s185_s1, 4  ;;  %s112_s22 = int_to_ptr.vmem [resolvable:$true] %s111_s22 }
  0x15   :  { %v27_v4 = vmax.f32 %v24_v1, %v26_v2  ;;  %s157_s23 = scalar_lea.vmem %s112_s22, 128  ;;  %p162_p9 = scmp.lt.s32.totalorder %s112_s22, %s112_s22 }
  0x16   :  { %v48_v9 = vcvt.s32.f32 %v46_v6  ;;  %v62_v16 = vsub.s32 0, %v46_v6  ;;  %vm81_vm1 = vcmp.lt.s32.totalorder %v78_v19, 32  ;;  %p158_p8 = scmp.ne.s32.totalorder %s112_s22, %s157_s23  ;;  %p163_p10 = scmp.lt.s32.totalorder %s157_s23, %s157_s23 }
  0x17   :  { %v28_v5 = vrot.slane %v27_v4, 2  ;;  %v121_v25 = vsel %vm81_vm1, 1.0, %v184_v0 }
  0x18   :  { %v63_v21 = vrot.slane %v25_v17, %v62_v16  ;;  %p164_p11 = por %p163_p10, %p162_p9 }
  0x19   :  { %v29_v7 = vmax.f32 %v27_v4, %v28_v5 }
  0x1a   :  { %vm64_vm2 = vcmp.eq.s32.totalorder %v46_v6, %v63_v21  ;;  %p165_p12 = pnand %p164_p11, %p158_p8 }
  0x1b   :  { %v30_v8 = vrot.slane %v29_v7, 1  ;;  %v65_v30 = vsel %vm64_vm2, %v24_v1, 0.0 }
  0x1c   :  { %v66_v33 = vrot.slane %v65_v30, 4 }
  0x1d   :  { %v31_v10 = vmax.f32 %v29_v7, %v30_v8 }
  0x1e   :  { %v67_v36 = vadd.f32 %v66_v33, %v65_v30 }
  0x1f   :  { %v32_v11 = vsub.f32 %v24_v1, %v31_v10  ;;  %vm47_vm0 = vcmp.eq.f32.partialorder %v24_v1, %v31_v10 }
  0x20   :  { %v49_v12 = vsel %vm47_vm0, %v48_v9, 8.0  ;;  %v68_v38 = vrot.slane %v67_v36, 2 }
  0x21   :  { %v33_v13 = vmul.f32 1.442695, %v32_v11  ;;  %v50_v14 = vrot.slane %v49_v12, 4 }
  0x22   :  { %v69_v39 = vadd.f32 %v68_v38, %v67_v36 }
  0x23   :  { %125 = vpow2.f32 %v33_v13  ;;  %v51_v15 = vmin.f32 %v49_v12, %v50_v14 }
  0x24   :  { %v70_v40 = vrot.slane %v69_v39, 1 }
  0x25   :  { %v52_v18 = vrot.slane %v51_v15, 2 }
  0x26   :  { %v71_v45 = vadd.f32 %v70_v40, %v69_v39 }
  0x27   :  { %v53_v20 = vmin.f32 %v51_v15, %v52_v18 }
  0x29   :  { %v54_v22 = vrot.slane %v53_v20, 1 }
  0x2b   :  { %v55_v24 = vmin.f32 %v53_v20, %v54_v22 }
  0x2d   :  { %v126_v26 = vpop.eup %125  ;;  %vm57_vm3 = vcmp.eq.f32.partialorder %v55_v24, %v56_v23 }
  0x2e   :  { %v35_v27 = vrot.slane %v126_v26, 4  ;;  %v120_v28 = vsel %vm57_vm3, 1.0, %v184_v0 }
  0x2f   :  { %v84_v29 = vmul.f32 %v121_v25, %v120_v28 }
  0x30   :  { %v36_v31 = vadd.f32 %v126_v26, %v35_v27 }
  0x31   :  { %100 = vst [vmem:[#allocation5 + $0x3] sm:$0x1] %v84_v29  ;;  %v85_v44 = vsub.f32 1.0, %v84_v29 }
  0x32   :  { %v37_v32 = vrot.slane %v36_v31, 2 }
  0x34   :  { %v38_v34 = vadd.f32 %v37_v32, %v36_v31 }
  0x36   :  { %v39_v35 = vrot.slane %v38_v34, 1 }
  0x38   :  { %v40_v37 = vadd.f32 %v39_v35, %v38_v34 }
  0x3a   :  { %127 = vrcp.f32 %v40_v37 }
  0x3b   :  { %129 = vlog2.f32 %v40_v37 }
  0x44   :  { %v128_v41 = vpop.eup %127 }
  0x45   :  { %v130_v42 = vpop.eup %129  ;;  %v43_v43 = vmax.f32 %v128_v41, 1e-12 }
  0x46   :  { %v73_v46 = vmul.f32 0.6931472, %v130_v42 }
  0x47   :  { %v44_v47 = vmin.f32 %v43_v43, 1.0 }
  0x48   :  { %v74_v48 = vadd.f32 %v73_v46, %v31_v10 }
  0x49   :  { %97 = vst [vmem:[#allocation5] sm:$0x1] %v44_v47  ;;  %v86_v49 = vmul.f32 %v85_v44, %v44_v47  ;;  %v88_v50 = vsub.f32 1.0, %v44_v47  ;;  %v91_v51 = vmul.f32 -2.5, %v44_v47  ;;  %v94_v52 = vmul.f32 2.5, %v44_v47 }
  0x4a   :  { %v75_v53 = vsub.f32 %v74_v48, %v71_v45 }
  0x4b   :  { %v87_v54 = vmul.f32 %v121_v25, %v86_v49  ;;  %v89_v55 = vmul.f32 %v88_v50, %v84_v29  ;;  %v92_v56 = vmul.f32 1.442695, %v91_v51  ;;  %v95_v57 = vmul.f32 1.442695, %v94_v52 }
  0x4c   :  { %v90_v58 = vmul.f32 %v121_v25, %v75_v53 }
  0x4d   :  { %98 = vst [vmem:[#allocation5 + $0x1] sm:$0x1] %v87_v54  ;;  %99 = vst [vmem:[#allocation5 + $0x2] sm:$0x1] %v89_v55  ;;  %131 = vpow2.f32 %v92_v56 }
  0x4e   :  { %101 = vst [vmem:[#allocation5 + $0x4] sm:$0x1] %v90_v58  ;;  %133 = vpow2.f32 %v95_v57 }
  0x57   :  { %v132_v59 = vpop.eup %131 }
  0x58   :  { %v134_v60 = vpop.eup %133  ;;  %102 = vst [vmem:[#allocation5 + $0x5] sm:$0x1] %v132_v59 }
  0x59   :  { %103 = vst [vmem:[#allocation5 + $0x6] sm:$0x1] %v134_v60 }
  0x5a   :  { %168 = shalt.err (!%p165_p12)
}
  0x5b   :  { %s169_s26 = scalar_lea.hbm %s230_s2, 128 }
  0x5c   :  { %p170_p13 = scmp.ne.s32.totalorder %s230_s2, %s169_s26  ;;  %p173_p0 = scmp.lt.u32.totalorder %s169_s26, %s230_s2 }
  0x5e   :  { %p175_p1 = pnand %p173_p0, %p170_p13 }
  0x60   :  { %178 = shalt.err (!%p175_p1)
}
  0x61   :  { %114 = dma.vmem_to_hbm [thread:$0]  %s112_s22, 128, %s230_s2, [#allocation4]  }
  0x62   :  { %181 = dma.done.wait [#allocation4], 128  }
  0x63   :  { %182 = vsyncadd [#allocation4], 4294967168 }
  0x64   :  { %118 = vsyncpa [#allocation3], 1 }
  0x65   :  { %119 = vsyncpa [#allocation4], 1 }

</bundles_post_ra>
